<compile_context>
chip_gen: v6e
topology: v6e:2x2x1
jax: 0.10.0
libtpu: 0.0.40
codegen_flags: <defaults>
</compile_context>

<pallas_src>
import jax
import jax.numpy as jnp
from jax.experimental import pallas as pl
from jax.experimental.pallas import tpu as pltpu

EMBEDDING_DIM = 6
HIDDEN_DIM = 6
VOCAB_SIZE = 9        # fixed by the spec's training data (9 distinct words)
TAGSET_SIZE = 3       # DET / NN / V
LANES = 128           # lane-dense slab / output width
OUT_ROWS = 8          # sublane-padded output rows (max sentence length <= 8)
NEG_BIG = -1e30       # "-inf" for padded tag lanes (finite -> no NaN)


def _align8(n):
    return ((n + 7) // 8) * 8


# Row offsets of each packed operand inside the single (SLAB_ROWS, 128) slab.
EMB_ROW = 0                                  # (V, 4H)  gate pre-activations
WHH_ROW = _align8(EMB_ROW + VOCAB_SIZE)      # (H, 4H)  recurrent weights (i,f,o,g)
WTAG_ROW = _align8(WHH_ROW + HIDDEN_DIM)     # (H, 128) tag weights, zero-padded lanes
BTAG_ROW = _align8(WTAG_ROW + HIDDEN_DIM)    # (1, 128) tag bias, -1e30 padded lanes
SLAB_ROWS = _align8(BTAG_ROW + 1)


def lstm_tagger_kernel(idx_ref, slab_ref, out_ref, hs_ref):
    S = idx_ref.shape[0]
    H = HIDDEN_DIM
    G3, G4 = 3 * H, 4 * H

    whh = slab_ref[WHH_ROW:WHH_ROW + H, 0:G4]            # (H, 4H)
    hs_ref[...] = jnp.zeros_like(hs_ref)                 # zero the padding rows

    h = jnp.zeros((1, H), jnp.float32)
    c = jnp.zeros((1, H), jnp.float32)

    for t in range(S):  # S is tiny and static -> unrolled
        # Fused gather: W_ih and both biases are folded into the table, so one
        # dynamic-row load yields the input-side gate pre-activations directly.
        gx = slab_ref[pl.ds(idx_ref[t], 1), 0:G4]        # (1, 4H)

        # Recurrent term h @ W_hh on the VPU: H independent broadcast products,
        # tree-summed (dependent depth ~3 instead of an H-long FMA chain).
        p = [h[:, k:k + 1] * whh[k:k + 1, :] for k in range(H)]
        gates = gx + ((p[0] + p[1]) + (p[2] + p[3])) + (p[4] + p[5])

        sig = jax.nn.sigmoid(gates[:, :G3])              # contiguous i, f, o
        i_g = sig[:, 0:H]
        f_g = sig[:, H:2 * H]
        o_g = sig[:, 2 * H:G3]
        g_g = jnp.tanh(gates[:, G3:G4])                  # trailing g
        c = f_g * c + i_g * g_g
        h = o_g * jnp.tanh(c)
        hs_ref[pl.ds(t, 1), :] = h                       # scratch row store

    # Tag projection + log_softmax once over all (padded) rows; single
    # lane-dense (8, 128) store. Padded lanes carry -1e30 bias -> exp == 0.
    wtag = slab_ref[WTAG_ROW:WTAG_ROW + H, :]            # (H, 128)
    btag = slab_ref[BTAG_ROW:BTAG_ROW + 1, :]            # (1, 128)
    tag = jnp.dot(hs_ref[...], wtag,
                  preferred_element_type=jnp.float32) + btag  # (8, 128)
    m = jnp.max(tag, axis=1, keepdims=True)
    lse = jnp.log(jnp.sum(jnp.exp(tag - m), axis=1, keepdims=True)) + m
    out_ref[...] = tag - lse


def prepare_params(emb_table, wih, whh, bih, bhh, wtag, btag):
    """One-time weight transform (runs once, NOT per call):
      * permute PyTorch gate order (i,f,g,o) -> (i,f,o,g)
      * fold W_ih and (b_ih + b_hh) into the embedding table
      * pack everything into a single lane-dense (SLAB_ROWS, 128) f32 slab."""
    V, _ = emb_table.shape
    H = whh.shape[1]
    T = wtag.shape[0]
    perm = jnp.concatenate([jnp.arange(0, 2 * H),
                            jnp.arange(3 * H, 4 * H),
                            jnp.arange(2 * H, 3 * H)])
    wih_p = wih[perm]                                    # (4H, E)
    whh_p = whh[perm]                                    # (4H, H)
    bias_p = (bih + bhh)[perm]                           # (4H,)
    emb_gates = emb_table @ wih_p.T + bias_p[None, :]    # (V, 4H)

    slab = jnp.zeros((SLAB_ROWS, LANES), jnp.float32)
    slab = slab.at[EMB_ROW:EMB_ROW + V, 0:4 * H].set(emb_gates)
    slab = slab.at[WHH_ROW:WHH_ROW + H, 0:4 * H].set(whh_p.T)
    slab = slab.at[WTAG_ROW:WTAG_ROW + H, 0:T].set(wtag.T)
    btag_row = jnp.full((LANES,), NEG_BIG, jnp.float32).at[0:T].set(btag)
    slab = slab.at[BTAG_ROW, :].set(btag_row)
    return slab


@jax.jit
def lstm_tagger_forward(idxs, slab):
    """Forward pass for one sentence of token ids, using the packed slab."""
    S = idxs.shape[0]
    assert S <= OUT_ROWS, "sentence longer than the padded output tile"
    # VMEM dynamic-row gather has no bounds check -> clamp untrusted ids.
    idxs = jnp.clip(idxs.astype(jnp.int32), 0, VOCAB_SIZE - 1)

    smem = pl.BlockSpec(memory_space=pltpu.MemorySpace.SMEM)
    vmem = pl.BlockSpec(memory_space=pltpu.MemorySpace.VMEM)
    out = pl.pallas_call(
        lstm_tagger_kernel,
        out_shape=jax.ShapeDtypeStruct((OUT_ROWS, LANES), jnp.float32),
        in_specs=[smem, vmem],
        out_specs=vmem,
        scratch_shapes=[pltpu.VMEM((OUT_ROWS, HIDDEN_DIM), jnp.float32)],
    )(idxs, slab)
    return out[:S, :TAGSET_SIZE]


def reference_forward(embeds, wih, whh, bih, bhh, wtag, btag):
    """Pure-JAX reference mirroring torch nn.LSTM + Linear + log_softmax
    (original PyTorch gate order i, f, g, o)."""
    H = whh.shape[1]
    h = jnp.zeros((H,), jnp.float32)
    c = jnp.zeros((H,), jnp.float32)
    outs = []
    for t in range(embeds.shape[0]):
        gates = embeds[t] @ wih.T + bih + h @ whh.T + bhh
        i = jax.nn.sigmoid(gates[0:H])
        f = jax.nn.sigmoid(gates[H:2 * H])
        g = jnp.tanh(gates[2 * H:3 * H])
        o = jax.nn.sigmoid(gates[3 * H:4 * H])
        c = f * c + i * g
        h = o * jnp.tanh(c)
        tag = h @ wtag.T + btag
        outs.append(jax.nn.log_softmax(tag))
    return jnp.stack(outs, axis=0)


if __name__ == "__main__":
    training_data = [
        ("My grandmother ate the polemta".split(),
         ["DET", "NN", "V", "DET", "NN"]),
        ("Marina read my book".split(),
         ["NN", "V", "DET", "NN"]),
    ]
    word_index = {}
    for sent, _ in training_data:
        for w in sent:
            if w not in word_index:
                word_index[w] = len(word_index)
    tag_to_ix = {"DET": 0, "NN": 1, "V": 2}
    assert len(word_index) == VOCAB_SIZE and len(tag_to_ix) == TAGSET_SIZE

    # Deterministic parameter init (shapes match nn.Embedding / nn.LSTM / nn.Linear).
    key = jax.random.PRNGKey(0)
    k_emb, k_wih, k_whh, k_bih, k_bhh, k_wt, k_bt = jax.random.split(key, 7)
    scale = 1.0 / (HIDDEN_DIM ** 0.5)
    emb_table = jax.random.normal(k_emb, (VOCAB_SIZE, EMBEDDING_DIM), jnp.float32)
    wih = jax.random.uniform(k_wih, (4 * HIDDEN_DIM, EMBEDDING_DIM), jnp.float32, -scale, scale)
    whh = jax.random.uniform(k_whh, (4 * HIDDEN_DIM, HIDDEN_DIM), jnp.float32, -scale, scale)
    bih = jax.random.uniform(k_bih, (4 * HIDDEN_DIM,), jnp.float32, -scale, scale)
    bhh = jax.random.uniform(k_bhh, (4 * HIDDEN_DIM,), jnp.float32, -scale, scale)
    wtag = jax.random.uniform(k_wt, (TAGSET_SIZE, HIDDEN_DIM), jnp.float32, -scale, scale)
    btag = jax.random.uniform(k_bt, (TAGSET_SIZE,), jnp.float32, -scale, scale)

    # One-time parameter packing (gate permutation, W_ih fold, slab layout).
    slab = jax.block_until_ready(
        prepare_params(emb_table, wih, whh, bih, bhh, wtag, btag))

    # prepare_sequence: token -> index (embedding lookup fused into the kernel).
    test_sentence = training_data[0][0]
    idxs = jnp.array([word_index[w] for w in test_sentence], dtype=jnp.int32)  # (S,)

    tag_scores = lstm_tagger_forward(idxs, slab)
    jax.block_until_ready(tag_scores)

    embeds = jnp.take(emb_table, idxs, axis=0)  # reference-side gather only
    ref = reference_forward(embeds, wih, whh, bih, bhh, wtag, btag)
    assert tag_scores.shape == (len(test_sentence), TAGSET_SIZE)
    assert jnp.max(jnp.abs(tag_scores - ref)) < 1e-4

    print("KERNEL_OK")
</pallas_src>

<mosaic_0001>
module attributes {stable_mosaic.version = 11 : i64} {
  func.func @lstm_tagger_kernel(%arg0: memref<5xi32, #tpu.memory_space<smem>>, %arg1: memref<40x128xf32, #tpu.memory_space<vmem>>, %arg2: memref<8x128xf32, #tpu.memory_space<vmem>>, %arg3: memref<8x6xf32, #tpu.memory_space<vmem>>) attributes {dimension_semantics = [], scalar_prefetch = 0 : i64, scratch_operands = 1 : i64, tpu.core_type = #tpu.core_type<tc>} {
    %c16 = arith.constant 16 : index
    %c0 = arith.constant 0 : index
    %0 = vector.load %arg1[%c16, %c0] : memref<40x128xf32, #tpu.memory_space<vmem>>, vector<6x24xf32>
    %cst = arith.constant 0.000000e+00 : f32
    %1 = vector.broadcast %cst : f32 to vector<8x6xf32>
    %c0_0 = arith.constant 0 : index
    %c0_1 = arith.constant 0 : index
    %2 = vector.load %arg3[%c0_0, %c0_1] : memref<8x6xf32, #tpu.memory_space<vmem>>, vector<8x6xf32>
    tpu.vector_store %arg3[%c0_0, %c0_1], %1 {strides = array<i32>} : memref<8x6xf32, #tpu.memory_space<vmem>>, vector<8x6xf32>,
    %cst_2 = arith.constant 0.000000e+00 : f32
    %3 = vector.broadcast %cst_2 : f32 to vector<1x6xf32>
    %cst_3 = arith.constant 0.000000e+00 : f32
    %4 = vector.broadcast %cst_3 : f32 to vector<1x6xf32>
    %c0_4 = arith.constant 0 : index
    %5 = memref.load %arg0[%c0_4] : memref<5xi32, #tpu.memory_space<smem>>
    %6 = arith.index_cast %5 : i32 to index
    %c0_5 = arith.constant 0 : index
    %7 = vector.load %arg1[%6, %c0_5] : memref<40x128xf32, #tpu.memory_space<vmem>>, vector<1x24xf32>
    %8 = vector.extract_strided_slice %3 {offsets = [0, 0], sizes = [1, 1], strides = [1, 1]} : vector<1x6xf32> to vector<1x1xf32>
    %9 = vector.extract_strided_slice %0 {offsets = [0, 0], sizes = [1, 24], strides = [1, 1]} : vector<6x24xf32> to vector<1x24xf32>
    %10 = vector.broadcast %8 : vector<1x1xf32> to vector<1x24xf32>
    %11 = arith.mulf %10, %9 : vector<1x24xf32>
    %12 = vector.extract_strided_slice %3 {offsets = [0, 1], sizes = [1, 1], strides = [1, 1]} : vector<1x6xf32> to vector<1x1xf32>
    %13 = vector.extract_strided_slice %0 {offsets = [1, 0], sizes = [1, 24], strides = [1, 1]} : vector<6x24xf32> to vector<1x24xf32>
    %14 = vector.broadcast %12 : vector<1x1xf32> to vector<1x24xf32>
    %15 = arith.mulf %14, %13 : vector<1x24xf32>
    %16 = vector.extract_strided_slice %3 {offsets = [0, 2], sizes = [1, 1], strides = [1, 1]} : vector<1x6xf32> to vector<1x1xf32>
    %17 = vector.extract_strided_slice %0 {offsets = [2, 0], sizes = [1, 24], strides = [1, 1]} : vector<6x24xf32> to vector<1x24xf32>
    %18 = vector.broadcast %16 : vector<1x1xf32> to vector<1x24xf32>
    %19 = arith.mulf %18, %17 : vector<1x24xf32>
    %20 = vector.extract_strided_slice %3 {offsets = [0, 3], sizes = [1, 1], strides = [1, 1]} : vector<1x6xf32> to vector<1x1xf32>
    %21 = vector.extract_strided_slice %0 {offsets = [3, 0], sizes = [1, 24], strides = [1, 1]} : vector<6x24xf32> to vector<1x24xf32>
    %22 = vector.broadcast %20 : vector<1x1xf32> to vector<1x24xf32>
    %23 = arith.mulf %22, %21 : vector<1x24xf32>
    %24 = vector.extract_strided_slice %3 {offsets = [0, 4], sizes = [1, 1], strides = [1, 1]} : vector<1x6xf32> to vector<1x1xf32>
    %25 = vector.extract_strided_slice %0 {offsets = [4, 0], sizes = [1, 24], strides = [1, 1]} : vector<6x24xf32> to vector<1x24xf32>
    %26 = vector.broadcast %24 : vector<1x1xf32> to vector<1x24xf32>
    %27 = arith.mulf %26, %25 : vector<1x24xf32>
    %28 = vector.extract_strided_slice %3 {offsets = [0, 5], sizes = [1, 1], strides = [1, 1]} : vector<1x6xf32> to vector<1x1xf32>
    %29 = vector.extract_strided_slice %0 {offsets = [5, 0], sizes = [1, 24], strides = [1, 1]} : vector<6x24xf32> to vector<1x24xf32>
    %30 = vector.broadcast %28 : vector<1x1xf32> to vector<1x24xf32>
    %31 = arith.mulf %30, %29 : vector<1x24xf32>
    %32 = arith.addf %11, %15 : vector<1x24xf32>
    %33 = arith.addf %19, %23 : vector<1x24xf32>
    %34 = arith.addf %32, %33 : vector<1x24xf32>
    %35 = arith.addf %7, %34 : vector<1x24xf32>
    %36 = arith.addf %27, %31 : vector<1x24xf32>
    %37 = arith.addf %35, %36 : vector<1x24xf32>
    %38 = vector.extract_strided_slice %37 {offsets = [0, 0], sizes = [1, 18], strides = [1, 1]} : vector<1x24xf32> to vector<1x18xf32>
    %39 = arith.negf %38 : vector<1x18xf32>
    %40 = math.exp %39 : vector<1x18xf32>
    %cst_6 = arith.constant 1.000000e+00 : f32
    %41 = vector.broadcast %cst_6 : f32 to vector<1x18xf32>
    %42 = arith.addf %41, %40 : vector<1x18xf32>
    %43 = arith.divf %41, %42 : vector<1x18xf32>
    %44 = vector.extract_strided_slice %43 {offsets = [0, 0], sizes = [1, 6], strides = [1, 1]} : vector<1x18xf32> to vector<1x6xf32>
    %45 = vector.extract_strided_slice %43 {offsets = [0, 6], sizes = [1, 6], strides = [1, 1]} : vector<1x18xf32> to vector<1x6xf32>
    %46 = vector.extract_strided_slice %43 {offsets = [0, 12], sizes = [1, 6], strides = [1, 1]} : vector<1x18xf32> to vector<1x6xf32>
    %47 = vector.extract_strided_slice %37 {offsets = [0, 18], sizes = [1, 6], strides = [1, 1]} : vector<1x24xf32> to vector<1x6xf32>
    %48 = math.tanh %47 : vector<1x6xf32>
    %49 = arith.mulf %45, %4 : vector<1x6xf32>
    %50 = arith.mulf %44, %48 : vector<1x6xf32>
    %51 = arith.addf %49, %50 : vector<1x6xf32>
    %52 = math.tanh %51 : vector<1x6xf32>
    %53 = arith.mulf %46, %52 : vector<1x6xf32>
    %c0_7 = arith.constant 0 : index
    %c0_8 = arith.constant 0 : index
    %54 = vector.load %arg3[%c0_7, %c0_8] : memref<8x6xf32, #tpu.memory_space<vmem>>, vector<1x6xf32>
    tpu.vector_store %arg3[%c0_7, %c0_8], %53 {strides = array<i32>} : memref<8x6xf32, #tpu.memory_space<vmem>>, vector<1x6xf32>,
    %c1 = arith.constant 1 : index
    %55 = memref.load %arg0[%c1] : memref<5xi32, #tpu.memory_space<smem>>
    %56 = arith.index_cast %55 : i32 to index
    %c0_9 = arith.constant 0 : index
    %57 = vector.load %arg1[%56, %c0_9] : memref<40x128xf32, #tpu.memory_space<vmem>>, vector<1x24xf32>
    %58 = vector.extract_strided_slice %53 {offsets = [0, 0], sizes = [1, 1], strides = [1, 1]} : vector<1x6xf32> to vector<1x1xf32>
    %59 = vector.extract_strided_slice %0 {offsets = [0, 0], sizes = [1, 24], strides = [1, 1]} : vector<6x24xf32> to vector<1x24xf32>
    %60 = vector.broadcast %58 : vector<1x1xf32> to vector<1x24xf32>
    %61 = arith.mulf %60, %59 : vector<1x24xf32>
    %62 = vector.extract_strided_slice %53 {offsets = [0, 1], sizes = [1, 1], strides = [1, 1]} : vector<1x6xf32> to vector<1x1xf32>
    %63 = vector.extract_strided_slice %0 {offsets = [1, 0], sizes = [1, 24], strides = [1, 1]} : vector<6x24xf32> to vector<1x24xf32>
    %64 = vector.broadcast %62 : vector<1x1xf32> to vector<1x24xf32>
    %65 = arith.mulf %64, %63 : vector<1x24xf32>
    %66 = vector.extract_strided_slice %53 {offsets = [0, 2], sizes = [1, 1], strides = [1, 1]} : vector<1x6xf32> to vector<1x1xf32>
    %67 = vector.extract_strided_slice %0 {offsets = [2, 0], sizes = [1, 24], strides = [1, 1]} : vector<6x24xf32> to vector<1x24xf32>
    %68 = vector.broadcast %66 : vector<1x1xf32> to vector<1x24xf32>
    %69 = arith.mulf %68, %67 : vector<1x24xf32>
    %70 = vector.extract_strided_slice %53 {offsets = [0, 3], sizes = [1, 1], strides = [1, 1]} : vector<1x6xf32> to vector<1x1xf32>
    %71 = vector.extract_strided_slice %0 {offsets = [3, 0], sizes = [1, 24], strides = [1, 1]} : vector<6x24xf32> to vector<1x24xf32>
    %72 = vector.broadcast %70 : vector<1x1xf32> to vector<1x24xf32>
    %73 = arith.mulf %72, %71 : vector<1x24xf32>
    %74 = vector.extract_strided_slice %53 {offsets = [0, 4], sizes = [1, 1], strides = [1, 1]} : vector<1x6xf32> to vector<1x1xf32>
    %75 = vector.extract_strided_slice %0 {offsets = [4, 0], sizes = [1, 24], strides = [1, 1]} : vector<6x24xf32> to vector<1x24xf32>
    %76 = vector.broadcast %74 : vector<1x1xf32> to vector<1x24xf32>
    %77 = arith.mulf %76, %75 : vector<1x24xf32>
    %78 = vector.extract_strided_slice %53 {offsets = [0, 5], sizes = [1, 1], strides = [1, 1]} : vector<1x6xf32> to vector<1x1xf32>
    %79 = vector.extract_strided_slice %0 {offsets = [5, 0], sizes = [1, 24], strides = [1, 1]} : vector<6x24xf32> to vector<1x24xf32>
    %80 = vector.broadcast %78 : vector<1x1xf32> to vector<1x24xf32>
    %81 = arith.mulf %80, %79 : vector<1x24xf32>
    %82 = arith.addf %61, %65 : vector<1x24xf32>
    %83 = arith.addf %69, %73 : vector<1x24xf32>
    %84 = arith.addf %82, %83 : vector<1x24xf32>
    %85 = arith.addf %57, %84 : vector<1x24xf32>
    %86 = arith.addf %77, %81 : vector<1x24xf32>
    %87 = arith.addf %85, %86 : vector<1x24xf32>
    %88 = vector.extract_strided_slice %87 {offsets = [0, 0], sizes = [1, 18], strides = [1, 1]} : vector<1x24xf32> to vector<1x18xf32>
    %89 = arith.negf %88 : vector<1x18xf32>
    %90 = math.exp %89 : vector<1x18xf32>
    %cst_10 = arith.constant 1.000000e+00 : f32
    %91 = vector.broadcast %cst_10 : f32 to vector<1x18xf32>
    %92 = arith.addf %91, %90 : vector<1x18xf32>
    %93 = arith.divf %91, %92 : vector<1x18xf32>
    %94 = vector.extract_strided_slice %93 {offsets = [0, 0], sizes = [1, 6], strides = [1, 1]} : vector<1x18xf32> to vector<1x6xf32>
    %95 = vector.extract_strided_slice %93 {offsets = [0, 6], sizes = [1, 6], strides = [1, 1]} : vector<1x18xf32> to vector<1x6xf32>
    %96 = vector.extract_strided_slice %93 {offsets = [0, 12], sizes = [1, 6], strides = [1, 1]} : vector<1x18xf32> to vector<1x6xf32>
    %97 = vector.extract_strided_slice %87 {offsets = [0, 18], sizes = [1, 6], strides = [1, 1]} : vector<1x24xf32> to vector<1x6xf32>
    %98 = math.tanh %97 : vector<1x6xf32>
    %99 = arith.mulf %95, %51 : vector<1x6xf32>
    %100 = arith.mulf %94, %98 : vector<1x6xf32>
    %101 = arith.addf %99, %100 : vector<1x6xf32>
    %102 = math.tanh %101 : vector<1x6xf32>
    %103 = arith.mulf %96, %102 : vector<1x6xf32>
    %c1_11 = arith.constant 1 : index
    %c0_12 = arith.constant 0 : index
    %104 = vector.load %arg3[%c1_11, %c0_12] : memref<8x6xf32, #tpu.memory_space<vmem>>, vector<1x6xf32>
    tpu.vector_store %arg3[%c1_11, %c0_12], %103 {strides = array<i32>} : memref<8x6xf32, #tpu.memory_space<vmem>>, vector<1x6xf32>,
    %c2 = arith.constant 2 : index
    %105 = memref.load %arg0[%c2] : memref<5xi32, #tpu.memory_space<smem>>
    %106 = arith.index_cast %105 : i32 to index
    %c0_13 = arith.constant 0 : index
    %107 = vector.load %arg1[%106, %c0_13] : memref<40x128xf32, #tpu.memory_space<vmem>>, vector<1x24xf32>
    %108 = vector.extract_strided_slice %103 {offsets = [0, 0], sizes = [1, 1], strides = [1, 1]} : vector<1x6xf32> to vector<1x1xf32>
    %109 = vector.extract_strided_slice %0 {offsets = [0, 0], sizes = [1, 24], strides = [1, 1]} : vector<6x24xf32> to vector<1x24xf32>
    %110 = vector.broadcast %108 : vector<1x1xf32> to vector<1x24xf32>
    %111 = arith.mulf %110, %109 : vector<1x24xf32>
    %112 = vector.extract_strided_slice %103 {offsets = [0, 1], sizes = [1, 1], strides = [1, 1]} : vector<1x6xf32> to vector<1x1xf32>
    %113 = vector.extract_strided_slice %0 {offsets = [1, 0], sizes = [1, 24], strides = [1, 1]} : vector<6x24xf32> to vector<1x24xf32>
    %114 = vector.broadcast %112 : vector<1x1xf32> to vector<1x24xf32>
    %115 = arith.mulf %114, %113 : vector<1x24xf32>
    %116 = vector.extract_strided_slice %103 {offsets = [0, 2], sizes = [1, 1], strides = [1, 1]} : vector<1x6xf32> to vector<1x1xf32>
    %117 = vector.extract_strided_slice %0 {offsets = [2, 0], sizes = [1, 24], strides = [1, 1]} : vector<6x24xf32> to vector<1x24xf32>
    %118 = vector.broadcast %116 : vector<1x1xf32> to vector<1x24xf32>
    %119 = arith.mulf %118, %117 : vector<1x24xf32>
    %120 = vector.extract_strided_slice %103 {offsets = [0, 3], sizes = [1, 1], strides = [1, 1]} : vector<1x6xf32> to vector<1x1xf32>
    %121 = vector.extract_strided_slice %0 {offsets = [3, 0], sizes = [1, 24], strides = [1, 1]} : vector<6x24xf32> to vector<1x24xf32>
    %122 = vector.broadcast %120 : vector<1x1xf32> to vector<1x24xf32>
    %123 = arith.mulf %122, %121 : vector<1x24xf32>
    %124 = vector.extract_strided_slice %103 {offsets = [0, 4], sizes = [1, 1], strides = [1, 1]} : vector<1x6xf32> to vector<1x1xf32>
    %125 = vector.extract_strided_slice %0 {offsets = [4, 0], sizes = [1, 24], strides = [1, 1]} : vector<6x24xf32> to vector<1x24xf32>
    %126 = vector.broadcast %124 : vector<1x1xf32> to vector<1x24xf32>
    %127 = arith.mulf %126, %125 : vector<1x24xf32>
    %128 = vector.extract_strided_slice %103 {offsets = [0, 5], sizes = [1, 1], strides = [1, 1]} : vector<1x6xf32> to vector<1x1xf32>
    %129 = vector.extract_strided_slice %0 {offsets = [5, 0], sizes = [1, 24], strides = [1, 1]} : vector<6x24xf32> to vector<1x24xf32>
    %130 = vector.broadcast %128 : vector<1x1xf32> to vector<1x24xf32>
    %131 = arith.mulf %130, %129 : vector<1x24xf32>
    %132 = arith.addf %111, %115 : vector<1x24xf32>
    %133 = arith.addf %119, %123 : vector<1x24xf32>
    %134 = arith.addf %132, %133 : vector<1x24xf32>
    %135 = arith.addf %107, %134 : vector<1x24xf32>
    %136 = arith.addf %127, %131 : vector<1x24xf32>
    %137 = arith.addf %135, %136 : vector<1x24xf32>
    %138 = vector.extract_strided_slice %137 {offsets = [0, 0], sizes = [1, 18], strides = [1, 1]} : vector<1x24xf32> to vector<1x18xf32>
    %139 = arith.negf %138 : vector<1x18xf32>
    %140 = math.exp %139 : vector<1x18xf32>
    %cst_14 = arith.constant 1.000000e+00 : f32
    %141 = vector.broadcast %cst_14 : f32 to vector<1x18xf32>
    %142 = arith.addf %141, %140 : vector<1x18xf32>
    %143 = arith.divf %141, %142 : vector<1x18xf32>
    %144 = vector.extract_strided_slice %143 {offsets = [0, 0], sizes = [1, 6], strides = [1, 1]} : vector<1x18xf32> to vector<1x6xf32>
    %145 = vector.extract_strided_slice %143 {offsets = [0, 6], sizes = [1, 6], strides = [1, 1]} : vector<1x18xf32> to vector<1x6xf32>
    %146 = vector.extract_strided_slice %143 {offsets = [0, 12], sizes = [1, 6], strides = [1, 1]} : vector<1x18xf32> to vector<1x6xf32>
    %147 = vector.extract_strided_slice %137 {offsets = [0, 18], sizes = [1, 6], strides = [1, 1]} : vector<1x24xf32> to vector<1x6xf32>
    %148 = math.tanh %147 : vector<1x6xf32>
    %149 = arith.mulf %145, %101 : vector<1x6xf32>
    %150 = arith.mulf %144, %148 : vector<1x6xf32>
    %151 = arith.addf %149, %150 : vector<1x6xf32>
    %152 = math.tanh %151 : vector<1x6xf32>
    %153 = arith.mulf %146, %152 : vector<1x6xf32>
    %c2_15 = arith.constant 2 : index
    %c0_16 = arith.constant 0 : index
    %154 = vector.load %arg3[%c2_15, %c0_16] : memref<8x6xf32, #tpu.memory_space<vmem>>, vector<1x6xf32>
    tpu.vector_store %arg3[%c2_15, %c0_16], %153 {strides = array<i32>} : memref<8x6xf32, #tpu.memory_space<vmem>>, vector<1x6xf32>,
    %c3 = arith.constant 3 : index
    %155 = memref.load %arg0[%c3] : memref<5xi32, #tpu.memory_space<smem>>
    %156 = arith.index_cast %155 : i32 to index
    %c0_17 = arith.constant 0 : index
    %157 = vector.load %arg1[%156, %c0_17] : memref<40x128xf32, #tpu.memory_space<vmem>>, vector<1x24xf32>
    %158 = vector.extract_strided_slice %153 {offsets = [0, 0], sizes = [1, 1], strides = [1, 1]} : vector<1x6xf32> to vector<1x1xf32>
    %159 = vector.extract_strided_slice %0 {offsets = [0, 0], sizes = [1, 24], strides = [1, 1]} : vector<6x24xf32> to vector<1x24xf32>
    %160 = vector.broadcast %158 : vector<1x1xf32> to vector<1x24xf32>
    %161 = arith.mulf %160, %159 : vector<1x24xf32>
    %162 = vector.extract_strided_slice %153 {offsets = [0, 1], sizes = [1, 1], strides = [1, 1]} : vector<1x6xf32> to vector<1x1xf32>
    %163 = vector.extract_strided_slice %0 {offsets = [1, 0], sizes = [1, 24], strides = [1, 1]} : vector<6x24xf32> to vector<1x24xf32>
    %164 = vector.broadcast %162 : vector<1x1xf32> to vector<1x24xf32>
    %165 = arith.mulf %164, %163 : vector<1x24xf32>
    %166 = vector.extract_strided_slice %153 {offsets = [0, 2], sizes = [1, 1], strides = [1, 1]} : vector<1x6xf32> to vector<1x1xf32>
    %167 = vector.extract_strided_slice %0 {offsets = [2, 0], sizes = [1, 24], strides = [1, 1]} : vector<6x24xf32> to vector<1x24xf32>
    %168 = vector.broadcast %166 : vector<1x1xf32> to vector<1x24xf32>
    %169 = arith.mulf %168, %167 : vector<1x24xf32>
    %170 = vector.extract_strided_slice %153 {offsets = [0, 3], sizes = [1, 1], strides = [1, 1]} : vector<1x6xf32> to vector<1x1xf32>
    %171 = vector.extract_strided_slice %0 {offsets = [3, 0], sizes = [1, 24], strides = [1, 1]} : vector<6x24xf32> to vector<1x24xf32>
    %172 = vector.broadcast %170 : vector<1x1xf32> to vector<1x24xf32>
    %173 = arith.mulf %172, %171 : vector<1x24xf32>
    %174 = vector.extract_strided_slice %153 {offsets = [0, 4], sizes = [1, 1], strides = [1, 1]} : vector<1x6xf32> to vector<1x1xf32>
    %175 = vector.extract_strided_slice %0 {offsets = [4, 0], sizes = [1, 24], strides = [1, 1]} : vector<6x24xf32> to vector<1x24xf32>
    %176 = vector.broadcast %174 : vector<1x1xf32> to vector<1x24xf32>
    %177 = arith.mulf %176, %175 : vector<1x24xf32>
    %178 = vector.extract_strided_slice %153 {offsets = [0, 5], sizes = [1, 1], strides = [1, 1]} : vector<1x6xf32> to vector<1x1xf32>
    %179 = vector.extract_strided_slice %0 {offsets = [5, 0], sizes = [1, 24], strides = [1, 1]} : vector<6x24xf32> to vector<1x24xf32>
    %180 = vector.broadcast %178 : vector<1x1xf32> to vector<1x24xf32>
    %181 = arith.mulf %180, %179 : vector<1x24xf32>
    %182 = arith.addf %161, %165 : vector<1x24xf32>
    %183 = arith.addf %169, %173 : vector<1x24xf32>
    %184 = arith.addf %182, %183 : vector<1x24xf32>
    %185 = arith.addf %157, %184 : vector<1x24xf32>
    %186 = arith.addf %177, %181 : vector<1x24xf32>
    %187 = arith.addf %185, %186 : vector<1x24xf32>
    %188 = vector.extract_strided_slice %187 {offsets = [0, 0], sizes = [1, 18], strides = [1, 1]} : vector<1x24xf32> to vector<1x18xf32>
    %189 = arith.negf %188 : vector<1x18xf32>
    %190 = math.exp %189 : vector<1x18xf32>
    %cst_18 = arith.constant 1.000000e+00 : f32
    %191 = vector.broadcast %cst_18 : f32 to vector<1x18xf32>
    %192 = arith.addf %191, %190 : vector<1x18xf32>
    %193 = arith.divf %191, %192 : vector<1x18xf32>
    %194 = vector.extract_strided_slice %193 {offsets = [0, 0], sizes = [1, 6], strides = [1, 1]} : vector<1x18xf32> to vector<1x6xf32>
    %195 = vector.extract_strided_slice %193 {offsets = [0, 6], sizes = [1, 6], strides = [1, 1]} : vector<1x18xf32> to vector<1x6xf32>
    %196 = vector.extract_strided_slice %193 {offsets = [0, 12], sizes = [1, 6], strides = [1, 1]} : vector<1x18xf32> to vector<1x6xf32>
    %197 = vector.extract_strided_slice %187 {offsets = [0, 18], sizes = [1, 6], strides = [1, 1]} : vector<1x24xf32> to vector<1x6xf32>
    %198 = math.tanh %197 : vector<1x6xf32>
    %199 = arith.mulf %195, %151 : vector<1x6xf32>
    %200 = arith.mulf %194, %198 : vector<1x6xf32>
    %201 = arith.addf %199, %200 : vector<1x6xf32>
    %202 = math.tanh %201 : vector<1x6xf32>
    %203 = arith.mulf %196, %202 : vector<1x6xf32>
    %c3_19 = arith.constant 3 : index
    %c0_20 = arith.constant 0 : index
    %204 = vector.load %arg3[%c3_19, %c0_20] : memref<8x6xf32, #tpu.memory_space<vmem>>, vector<1x6xf32>
    tpu.vector_store %arg3[%c3_19, %c0_20], %203 {strides = array<i32>} : memref<8x6xf32, #tpu.memory_space<vmem>>, vector<1x6xf32>,
    %c4 = arith.constant 4 : index
    %205 = memref.load %arg0[%c4] : memref<5xi32, #tpu.memory_space<smem>>
    %206 = arith.index_cast %205 : i32 to index
    %c0_21 = arith.constant 0 : index
    %207 = vector.load %arg1[%206, %c0_21] : memref<40x128xf32, #tpu.memory_space<vmem>>, vector<1x24xf32>
    %208 = vector.extract_strided_slice %203 {offsets = [0, 0], sizes = [1, 1], strides = [1, 1]} : vector<1x6xf32> to vector<1x1xf32>
    %209 = vector.extract_strided_slice %0 {offsets = [0, 0], sizes = [1, 24], strides = [1, 1]} : vector<6x24xf32> to vector<1x24xf32>
    %210 = vector.broadcast %208 : vector<1x1xf32> to vector<1x24xf32>
    %211 = arith.mulf %210, %209 : vector<1x24xf32>
    %212 = vector.extract_strided_slice %203 {offsets = [0, 1], sizes = [1, 1], strides = [1, 1]} : vector<1x6xf32> to vector<1x1xf32>
    %213 = vector.extract_strided_slice %0 {offsets = [1, 0], sizes = [1, 24], strides = [1, 1]} : vector<6x24xf32> to vector<1x24xf32>
    %214 = vector.broadcast %212 : vector<1x1xf32> to vector<1x24xf32>
    %215 = arith.mulf %214, %213 : vector<1x24xf32>
    %216 = vector.extract_strided_slice %203 {offsets = [0, 2], sizes = [1, 1], strides = [1, 1]} : vector<1x6xf32> to vector<1x1xf32>
    %217 = vector.extract_strided_slice %0 {offsets = [2, 0], sizes = [1, 24], strides = [1, 1]} : vector<6x24xf32> to vector<1x24xf32>
    %218 = vector.broadcast %216 : vector<1x1xf32> to vector<1x24xf32>
    %219 = arith.mulf %218, %217 : vector<1x24xf32>
    %220 = vector.extract_strided_slice %203 {offsets = [0, 3], sizes = [1, 1], strides = [1, 1]} : vector<1x6xf32> to vector<1x1xf32>
    %221 = vector.extract_strided_slice %0 {offsets = [3, 0], sizes = [1, 24], strides = [1, 1]} : vector<6x24xf32> to vector<1x24xf32>
    %222 = vector.broadcast %220 : vector<1x1xf32> to vector<1x24xf32>
    %223 = arith.mulf %222, %221 : vector<1x24xf32>
    %224 = vector.extract_strided_slice %203 {offsets = [0, 4], sizes = [1, 1], strides = [1, 1]} : vector<1x6xf32> to vector<1x1xf32>
    %225 = vector.extract_strided_slice %0 {offsets = [4, 0], sizes = [1, 24], strides = [1, 1]} : vector<6x24xf32> to vector<1x24xf32>
    %226 = vector.broadcast %224 : vector<1x1xf32> to vector<1x24xf32>
    %227 = arith.mulf %226, %225 : vector<1x24xf32>
    %228 = vector.extract_strided_slice %203 {offsets = [0, 5], sizes = [1, 1], strides = [1, 1]} : vector<1x6xf32> to vector<1x1xf32>
    %229 = vector.extract_strided_slice %0 {offsets = [5, 0], sizes = [1, 24], strides = [1, 1]} : vector<6x24xf32> to vector<1x24xf32>
    %230 = vector.broadcast %228 : vector<1x1xf32> to vector<1x24xf32>
    %231 = arith.mulf %230, %229 : vector<1x24xf32>
    %232 = arith.addf %211, %215 : vector<1x24xf32>
    %233 = arith.addf %219, %223 : vector<1x24xf32>
    %234 = arith.addf %232, %233 : vector<1x24xf32>
    %235 = arith.addf %207, %234 : vector<1x24xf32>
    %236 = arith.addf %227, %231 : vector<1x24xf32>
    %237 = arith.addf %235, %236 : vector<1x24xf32>
    %238 = vector.extract_strided_slice %237 {offsets = [0, 0], sizes = [1, 18], strides = [1, 1]} : vector<1x24xf32> to vector<1x18xf32>
    %239 = arith.negf %238 : vector<1x18xf32>
    %240 = math.exp %239 : vector<1x18xf32>
    %cst_22 = arith.constant 1.000000e+00 : f32
    %241 = vector.broadcast %cst_22 : f32 to vector<1x18xf32>
    %242 = arith.addf %241, %240 : vector<1x18xf32>
    %243 = arith.divf %241, %242 : vector<1x18xf32>
    %244 = vector.extract_strided_slice %243 {offsets = [0, 0], sizes = [1, 6], strides = [1, 1]} : vector<1x18xf32> to vector<1x6xf32>
    %245 = vector.extract_strided_slice %243 {offsets = [0, 6], sizes = [1, 6], strides = [1, 1]} : vector<1x18xf32> to vector<1x6xf32>
    %246 = vector.extract_strided_slice %243 {offsets = [0, 12], sizes = [1, 6], strides = [1, 1]} : vector<1x18xf32> to vector<1x6xf32>
    %247 = vector.extract_strided_slice %237 {offsets = [0, 18], sizes = [1, 6], strides = [1, 1]} : vector<1x24xf32> to vector<1x6xf32>
    %248 = math.tanh %247 : vector<1x6xf32>
    %249 = arith.mulf %245, %201 : vector<1x6xf32>
    %250 = arith.mulf %244, %248 : vector<1x6xf32>
    %251 = arith.addf %249, %250 : vector<1x6xf32>
    %252 = math.tanh %251 : vector<1x6xf32>
    %253 = arith.mulf %246, %252 : vector<1x6xf32>
    %c4_23 = arith.constant 4 : index
    %c0_24 = arith.constant 0 : index
    %254 = vector.load %arg3[%c4_23, %c0_24] : memref<8x6xf32, #tpu.memory_space<vmem>>, vector<1x6xf32>
    tpu.vector_store %arg3[%c4_23, %c0_24], %253 {strides = array<i32>} : memref<8x6xf32, #tpu.memory_space<vmem>>, vector<1x6xf32>,
    %c24 = arith.constant 24 : index
    %c0_25 = arith.constant 0 : index
    %255 = vector.load %arg1[%c24, %c0_25] : memref<40x128xf32, #tpu.memory_space<vmem>>, vector<6x128xf32>
    %c32 = arith.constant 32 : index
    %c0_26 = arith.constant 0 : index
    %256 = vector.load %arg1[%c32, %c0_26] : memref<40x128xf32, #tpu.memory_space<vmem>>, vector<1x128xf32>
    %c0_27 = arith.constant 0 : index
    %c0_28 = arith.constant 0 : index
    %257 = vector.load %arg3[%c0_27, %c0_28] : memref<8x6xf32, #tpu.memory_space<vmem>>, vector<8x6xf32>
    %cst_29 = arith.constant dense<0.000000e+00> : vector<8x128xf32>
    %258 = tpu.matmul %257, %255, %cst_29 {dimension_numbers = #tpu.dot_dimension_numbers<[1], [0], [0], [1], [0, 0, 1, 1], [], []>} : vector<8x6xf32>, vector<6x128xf32>, vector<8x128xf32> -> vector<8x128xf32>
    %259 = vector.broadcast %256 : vector<1x128xf32> to vector<8x128xf32>
    %260 = arith.addf %258, %259 : vector<8x128xf32>
    %cst_30 = arith.constant dense<0xFF800000> : vector<8xf32>
    %261 = vector.multi_reduction <maximumf>, %260, %cst_30 [1] : vector<8x128xf32> to vector<8xf32>
    %262 = vector.shape_cast %261 : vector<8xf32> to vector<8x1xf32>
    %263 = vector.broadcast %262 : vector<8x1xf32> to vector<8x128xf32>
    %264 = arith.subf %260, %263 : vector<8x128xf32>
    %265 = math.exp %264 : vector<8x128xf32>
    %cst_31 = arith.constant dense<0.000000e+00> : vector<8xf32>
    %266 = vector.multi_reduction <add>, %265, %cst_31 [1] : vector<8x128xf32> to vector<8xf32>
    %267 = vector.shape_cast %266 : vector<8xf32> to vector<8x1xf32>
    %268 = math.log %267 : vector<8x1xf32>
    %269 = arith.addf %268, %262 : vector<8x1xf32>
    %270 = vector.broadcast %269 : vector<8x1xf32> to vector<8x128xf32>
    %271 = arith.subf %260, %270 : vector<8x128xf32>
    %c0_32 = arith.constant 0 : index
    %c0_33 = arith.constant 0 : index
    %272 = vector.load %arg2[%c0_32, %c0_33] : memref<8x128xf32, #tpu.memory_space<vmem>>, vector<8x128xf32>
    tpu.vector_store %arg2[%c0_32, %c0_33], %271 {strides = array<i32>} : memref<8x128xf32, #tpu.memory_space<vmem>>, vector<8x128xf32>,
    return
  }
}

</mosaic_0001>

<bundles_post_ra>
// kernel: lstm_tagger_forward.1
= control target key start
LH: loop header
LB: loop body
LE: loop exit
PB: predicated region body
PF: predicated region fallthrough
CT: control target
= control target key end

     0   :  { %7 = vsyncpa [#allocation5], 0  ;;  %s784_s0 = inlined_call_operand.vmem [shape: s32[5], index: 0, kind: input, shape index: {}]   ;;  %s785_s1 = inlined_call_operand.hbm [shape: f32[40,128], index: 1, kind: input, shape index: {}]   ;;  %s786_s2 = inlined_call_operand.vmem [shape: f32[8,128], index: 2, kind: output, shape index: {}]  }
   0x1   :  { %s15_s11 = sshll.u32 %s784_s0, 4  ;;  %s16_s11 = int_to_ptr.vmem [resolvable:$true] %s15_s11 }
   0x2   :  { %8 = vsyncpa [#allocation4], 0  ;;  %s580_s12 = scalar_lea.vmem %s16_s11, 16  ;;  %p585_p1 = scmp.lt.s32.totalorder %s16_s11, %s16_s11 }
   0x3   :  { %p581_p0 = scmp.ne.s32.totalorder %s16_s11, %s580_s12  ;;  %p586_p2 = scmp.lt.s32.totalorder %s580_s12, %s580_s12 }
   0x5   :  { %p587_p3 = por %p586_p2, %p585_p1 }
   0x7   :  { %p588_p4 = pnand %p587_p3, %p581_p0 }
   0x9   :  { %591 = shalt.err (!%p588_p4)
}
   0xa   :  { %s616_s13 = smov [#allocation3]   ;;  %s617_s14 = smov [#allocation6]  }
   0xb   :  { %18 = dma.vmem_to_smem %s16_s11, 16, %s616_s13, [#allocation5]  }
   0xc   :  { %s24_s15 = sshll.u32 %s617_s14, 4  ;;  %s25_s15 = int_to_ptr.vmem [resolvable:$true] %s24_s15 }
   0xd   :  { %s600_s16 = scalar_lea.vmem %s25_s15, 640  ;;  %p605_p6 = scmp.lt.s32.totalorder %s25_s15, %s25_s15 }
   0xe   :  { %p601_p5 = scmp.ne.s32.totalorder %s25_s15, %s600_s16  ;;  %p606_p7 = scmp.lt.s32.totalorder %s600_s16, %s600_s16 }
  0x10   :  { %p607_p8 = por %p606_p7, %p605_p6 }
  0x12   :  { %p608_p9 = pnand %p607_p8, %p601_p5 }
  0x14   :  { %611 = shalt.err (!%p608_p9)
}
  0x15   :  { %s618_s0 = smov 128   ;;  %s619_s17 = smov 8  }
  0x16   :  { %30 = dma.hbm_to_vmem [thread:$0]  %s785_s1, 640, %s25_s15, [#allocation4], %s618_s0, %s618_s0, %s619_s17  }
  0x17   :  { %612 = dma.done.wait [#allocation5], 16  }
  0x18   :  { %613 = vsyncadd [#allocation5], 4294967280 }
  0x19   :  { %614 = dma.done.wait [#allocation4], 640  }
  0x1a   :  { %615 = vsyncadd [#allocation4], 4294966656 }
  0x1b   :  { %37 = sfence }
  0x1c   :  { %v652_v0 = vld [vmem:[#allocation6 + $0x10] sm:$0x3f]  ;;  %s41_s20 = sld [smem:[#allocation3]]  ;;  %s620_s1 = smov 110   ;;  %v622_v20 = vmov 13   ;;  %v623_v21 = vmov 12  }
  0x1d   :  { %v44_v1 = vmul.f32 0.0, %v652_v0  ;;  %s621_s22 = smov 6   ;;  %512 = vset.pattern.permute.xlu0 %v622_v20  ;;  %511 = vset.pattern.permute.xlu1 %v623_v21  ;;  %v624_v25 = vmov 16   ;;  %v625_v26 = vmov 14   ;;  %v626_v27 = vmov 15   ;;  %s478_s23 = sld [smem:[#allocation3 + $0x1]] }
  0x1e   :  { %v627_v28 = vmov 17   ;;  %v678_v30 = vrot.slane %v652_v0, 1  ;;  %v681_v33 = vrot.slane %v652_v0, 2  ;;  %v684_v34 = vrot.slane %v652_v0, 3  ;;  %s480_s25 = sld [smem:[#allocation3 + $0x2]]  ;;  %s629_s3 = smov 116  }
  0x1f   :  { %v46_v2 = vrot.slane %v44_v1, 1  ;;  %v691_v40 = vrot.slane %v652_v0, 4  ;;  %v694_v41 = vrot.slane %v652_v0, 5  ;;  %s482_s27 = sld [smem:[#allocation3 + $0x3]]  ;;  %vm39_vm0 = vcmask 48128  }
  0x20   :  { %s484_s29 = sld [smem:[#allocation3 + $0x4]]  ;;  %vm85_vm1 = vcmask 40960   ;;  %vm380_vm2 = vcmask 1045504   ;;  %vm630_vm3 = vmmov 0  }
  0x21   :  { %v48_v3 = vadd.f32 %v46_v2, %v44_v1 }
  0x22   :  { %s42_s21 = scalar_lea.vmem [#allocation6], %s41_s20 }
  0x23   :  { %v50_v4 = vrot.slane %v48_v3, 2  ;;  %v43_v5 = vld [vmem:[%s42_s21] sm:$0x1]  ;;  %v54_v7 = vrot.slane %v48_v3, 4  ;;  %s88_s24 = scalar_lea.vmem [#allocation6], %s478_s23 }
  0x24   :  { %v89_v45 = vld [vmem:[%s88_s24] sm:$0x1]  ;;  %s167_s26 = scalar_lea.vmem [#allocation6], %s480_s25 }
  0x25   :  { %v52_v6 = vadd.f32 %v50_v4, %v48_v3  ;;  %s235_s28 = scalar_lea.vmem [#allocation6], %s482_s27 }
  0x26   :  { %s303_s30 = scalar_lea.vmem [#allocation6], %s484_s29 }
  0x27   :  { %v53_v8 = vadd.f32 %v52_v6, %v43_v5 }
  0x29   :  { %v56_v9 = vadd.f32 %v54_v7, %v53_v8 }
  0x2b   :  { %536 = vtanh.f32 %v56_v9  ;;  %v477_v11 = vmul.f32 -1.442695, %v56_v9 }
  0x2d   :  { %538 = vpow2.f32 %v477_v11 }
  0x38   :  { %v537_v10 = vpop.eup %536 }
  0x39   :  { %66 = vrot.lane.b32.xlu0 %v537_v10, %s620_s1 }
  0x3a   :  { %v539_v12 = vpop.eup %538 }
  0x3b   :  { %v60_v13 = vadd.f32 1.0, %v539_v12 }
  0x3d   :  { %540 = vrcp.f32 %v60_v13 }
  0x4a   :  { %v541_v14 = vpop.eup %540 }
  0x4b   :  { %v64_v17 = vmul.f32 0.0, %v541_v14 }
  0xab   :  { %v67_v15 = vpop.permute.xlu0 %66 }
  0xac   :  { %v69_v16 = vmul.f32 %v541_v14, %v67_v15  ;;  %v168_v15 = vld [vmem:[%s167_s26] sm:$0x1] }
  0xae   :  { %71 = vrot.lane.b32.xlu0 %v69_v16, %s621_s22 }
 0x120   :  { %v72_v18 = vpop.permute.xlu0 %71 }
 0x121   :  { %v657_v19 = vadd.f32 %v72_v18, %v64_v17 }
 0x123   :  { %542 = vtanh.f32 %v657_v19 }
 0x130   :  { %v543_v22 = vpop.eup %542 }
 0x131   :  { %77 = vrot.lane.b32.xlu1 %v543_v22, %s621_s22 }
 0x1a3   :  { %v78_v23 = vpop.permute.xlu1 %77 }
 0x1a4   :  { %v663_v24 = vmul.f32 %v541_v14, %v78_v23 }
 0x1a6   :  { %96 = vperm.xlu0 %512, %v663_v24   ;;  %91 = vperm.xlu1 %511, %v663_v24  }
 0x1aa   :  { %515 = vset.pattern.permute.xlu0 %v624_v25  ;;  %513 = vset.pattern.permute.xlu1 %v625_v26 }
 0x1ab   :  { %118 = vperm.xlu0 %515, %v663_v24   ;;  %104 = vperm.xlu1 %513, %v663_v24  }
 0x1af   :  { %514 = vset.pattern.permute.xlu1 %v626_v27  ;;  %517 = vset.pattern.permute.xlu0 %v623_v21 }
 0x1b0   :  { %111 = vperm.xlu1 %514, %v663_v24  }
 0x1b4   :  { %516 = vset.pattern.permute.xlu1 %v627_v28 }
 0x1b5   :  { %125 = vperm.xlu1 %516, %v663_v24  }
 0x1b9   :  { %518 = vset.pattern.permute.xlu1 %v622_v20 }
 0x221   :  { %v92_v29 = vpop.permute.xlu1 %91  ;;  %v97_v32 = vpop.permute.xlu0 %96 }
 0x222   :  { %v102_v35 = vmul.f32 %v678_v30, %v97_v32  ;;  %v94_v36 = vmul.f32 %v92_v29, %v652_v0 }
 0x224   :  { %v131_v42 = vadd.f32 %v102_v35, %v94_v36 }
 0x226   :  { %v105_v31 = vpop.permute.xlu1 %104  ;;  %v119_v43 = vpop.permute.xlu0 %118 }
 0x227   :  { %v109_v38 = vmul.f32 %v681_v33, %v105_v31  ;;  %v123_v48 = vmul.f32 %v691_v40, %v119_v43 }
 0x22b   :  { %v112_v37 = vpop.permute.xlu1 %111 }
 0x22c   :  { %v116_v39 = vmul.f32 %v684_v34, %v112_v37 }
 0x22e   :  { %v132_v44 = vadd.f32 %v116_v39, %v109_v38 }
 0x230   :  { %v133_v46 = vadd.f32 %v132_v44, %v131_v42  ;;  %v126_v47 = vpop.permute.xlu1 %125 }
 0x231   :  { %v130_v49 = vmul.f32 %v694_v41, %v126_v47 }
 0x232   :  { %v134_v50 = vadd.f32 %v133_v46, %v89_v45 }
 0x233   :  { %v135_v51 = vadd.f32 %v130_v49, %v123_v48 }
 0x235   :  { %v136_v52 = vadd.f32 %v135_v51, %v134_v50 }
 0x237   :  { %544 = vtanh.f32 %v136_v52  ;;  %v479_v54 = vmul.f32 -1.442695, %v136_v52 }
 0x239   :  { %546 = vpow2.f32 %v479_v54 }
 0x244   :  { %v545_v53 = vpop.eup %544 }
 0x245   :  { %146 = vrot.lane.b32.xlu1 %v545_v53, %s620_s1 }
 0x246   :  { %v547_v55 = vpop.eup %546 }
 0x247   :  { %v140_v56 = vadd.f32 1.0, %v547_v55 }
 0x249   :  { %548 = vrcp.f32 %v140_v56 }
 0x256   :  { %v549_v57 = vpop.eup %548 }
 0x257   :  { %v144_v60 = vmul.f32 %v549_v57, %v657_v19 }
 0x2b7   :  { %v147_v58 = vpop.permute.xlu1 %146 }
 0x2b8   :  { %v149_v59 = vmul.f32 %v549_v57, %v147_v58 }
 0x2ba   :  { %151 = vrot.lane.b32.xlu0 %v149_v59, %s621_s22 }
 0x32c   :  { %v152_v61 = vpop.permute.xlu0 %151 }
 0x32d   :  { %v154_v62 = vadd.f32 %v152_v61, %v144_v60 }
 0x32f   :  { %550 = vtanh.f32 %v154_v62 }
 0x33c   :  { %v551_v63 = vpop.eup %550 }
 0x33d   :  { %157 = vrot.lane.b32.xlu1 %v551_v63, %s621_s22 }
 0x3af   :  { %v158_v1 = vpop.permute.xlu1 %157 }
 0x3b0   :  { %v702_v2 = vmul.f32 %v549_v57, %v158_v1  ;;  %v236_v57 = vld [vmem:[%s235_s28] sm:$0x1] }
 0x3b2   :  { %175 = vperm.xlu1 %518, %v702_v2   ;;  %170 = vperm.xlu0 %517, %v702_v2  }
 0x3b6   :  { %519 = vset.pattern.permute.xlu1 %v625_v26  ;;  %520 = vset.pattern.permute.xlu0 %v626_v27 }
 0x3b7   :  { %180 = vperm.xlu1 %519, %v702_v2   ;;  %185 = vperm.xlu0 %520, %v702_v2  }
 0x3bb   :  { %521 = vset.pattern.permute.xlu1 %v624_v25  ;;  %524 = vset.pattern.permute.xlu0 %v622_v20 }
 0x3bc   :  { %190 = vperm.xlu1 %521, %v702_v2  }
 0x3c0   :  { %522 = vset.pattern.permute.xlu1 %v627_v28 }
 0x3c1   :  { %195 = vperm.xlu1 %522, %v702_v2  }
 0x3c5   :  { %523 = vset.pattern.permute.xlu1 %v623_v21 }
 0x42d   :  { %v176_v3 = vpop.permute.xlu1 %175  ;;  %v171_v4 = vpop.permute.xlu0 %170 }
 0x42e   :  { %v178_v9 = vmul.f32 %v176_v3, %v678_v30  ;;  %v173_v10 = vmul.f32 %v171_v4, %v652_v0 }
 0x430   :  { %v199_v13 = vadd.f32 %v178_v9, %v173_v10 }
 0x432   :  { %v181_v5 = vpop.permute.xlu1 %180  ;;  %v186_v6 = vpop.permute.xlu0 %185 }
 0x433   :  { %v183_v7 = vmul.f32 %v181_v5, %v681_v33  ;;  %v188_v8 = vmul.f32 %v186_v6, %v684_v34 }
 0x435   :  { %v200_v11 = vadd.f32 %v188_v8, %v183_v7 }
 0x437   :  { %v191_v12 = vpop.permute.xlu1 %190  ;;  %v201_v14 = vadd.f32 %v200_v11, %v199_v13 }
 0x438   :  { %v193_v17 = vmul.f32 %v191_v12, %v691_v40 }
 0x439   :  { %v202_v19 = vadd.f32 %v201_v14, %v168_v15 }
 0x43c   :  { %v196_v16 = vpop.permute.xlu1 %195 }
 0x43d   :  { %v198_v18 = vmul.f32 %v196_v16, %v694_v41 }
 0x43f   :  { %v203_v22 = vadd.f32 %v198_v18, %v193_v17 }
 0x441   :  { %v204_v23 = vadd.f32 %v203_v22, %v202_v19 }
 0x443   :  { %552 = vtanh.f32 %v204_v23  ;;  %v481_v31 = vmul.f32 -1.442695, %v204_v23 }
 0x445   :  { %554 = vpow2.f32 %v481_v31 }
 0x450   :  { %v553_v29 = vpop.eup %552 }
 0x451   :  { %214 = vrot.lane.b32.xlu0 %v553_v29, %s620_s1 }
 0x452   :  { %v555_v32 = vpop.eup %554 }
 0x453   :  { %v208_v35 = vadd.f32 1.0, %v555_v32 }
 0x455   :  { %556 = vrcp.f32 %v208_v35 }
 0x462   :  { %v557_v36 = vpop.eup %556 }
 0x463   :  { %v212_v39 = vmul.f32 %v557_v36, %v154_v62 }
 0x4c3   :  { %v215_v37 = vpop.permute.xlu0 %214 }
 0x4c4   :  { %v217_v38 = vmul.f32 %v557_v36, %v215_v37 }
 0x4c6   :  { %219 = vrot.lane.b32.xlu1 %v217_v38, %s621_s22 }
 0x538   :  { %v220_v42 = vpop.permute.xlu1 %219 }
 0x539   :  { %v222_v43 = vadd.f32 %v220_v42, %v212_v39  ;;  %v628_v42 = vmov 0.0  }
 0x53a   :  { %40 = vst.msk [vmem:[#allocation2] sm:$0xff] %vm39_vm0, %v628_v42  ;;  %491 = vmatprep.subr.mxu0 %v628_v42  ;;  %493 = vmatprep.mubr.msk.f32.mxu0 %vm630_vm3, %v628_v42 }
 0x53b   :  { %558 = vtanh.f32 %v222_v43 }
 0x548   :  { %v559_v44 = vpop.eup %558 }
 0x549   :  { %225 = vrot.lane.b32.xlu0 %v559_v44, %s621_s22 }
 0x5bb   :  { %v226_v45 = vpop.permute.xlu0 %225 }
 0x5bc   :  { %v725_v46 = vmul.f32 %v557_v36, %v226_v45 }
 0x5be   :  { %243 = vperm.xlu0 %524, %v725_v46   ;;  %238 = vperm.xlu1 %523, %v725_v46  }
 0x5c2   :  { %527 = vset.pattern.permute.xlu0 %v624_v25  ;;  %525 = vset.pattern.permute.xlu1 %v625_v26 }
 0x5c3   :  { %258 = vperm.xlu0 %527, %v725_v46   ;;  %248 = vperm.xlu1 %525, %v725_v46  }
 0x5c7   :  { %526 = vset.pattern.permute.xlu1 %v626_v27  ;;  %529 = vset.pattern.permute.xlu0 %v623_v21 }
 0x5c8   :  { %253 = vperm.xlu1 %526, %v725_v46  }
 0x5cc   :  { %528 = vset.pattern.permute.xlu1 %v627_v28 }
 0x5cd   :  { %263 = vperm.xlu1 %528, %v725_v46  }
 0x5d1   :  { %530 = vset.pattern.permute.xlu1 %v622_v20 }
 0x639   :  { %v239_v47 = vpop.permute.xlu1 %238  ;;  %v244_v49 = vpop.permute.xlu0 %243 }
 0x63a   :  { %v246_v50 = vmul.f32 %v244_v49, %v678_v30  ;;  %v241_v51 = vmul.f32 %v239_v47, %v652_v0 }
 0x63c   :  { %v267_v54 = vadd.f32 %v246_v50, %v241_v51 }
 0x63e   :  { %v249_v48 = vpop.permute.xlu1 %248  ;;  %v259_v55 = vpop.permute.xlu0 %258 }
 0x63f   :  { %v251_v53 = vmul.f32 %v249_v48, %v681_v33  ;;  %v261_v59 = vmul.f32 %v259_v55, %v691_v40 }
 0x643   :  { %v254_v52 = vpop.permute.xlu1 %253 }
 0x644   :  { %v256_v21 = vmul.f32 %v254_v52, %v684_v34 }
 0x646   :  { %v268_v56 = vadd.f32 %v256_v21, %v251_v53 }
 0x648   :  { %v269_v58 = vadd.f32 %v268_v56, %v267_v54  ;;  %v264_v20 = vpop.permute.xlu1 %263  ;;  %v486_v54 = vld [vmem:[#allocation6 + $0x20] ss:$0 sm:$0xff] }
 0x649   :  { %v266_v60 = vmul.f32 %v264_v20, %v694_v41 }
 0x64a   :  { %v270_v61 = vadd.f32 %v269_v58, %v236_v57 }
 0x64b   :  { %v271_v62 = vadd.f32 %v266_v60, %v261_v59 }
 0x64d   :  { %v272_v63 = vadd.f32 %v271_v62, %v270_v61 }
 0x64f   :  { %560 = vtanh.f32 %v272_v63  ;;  %v483_v3 = vmul.f32 -1.442695, %v272_v63 }
 0x651   :  { %562 = vpow2.f32 %v483_v3 }
 0x65c   :  { %v561_v1 = vpop.eup %560 }
 0x65d   :  { %282 = vrot.lane.b32.xlu1 %v561_v1, %s620_s1 }
 0x65e   :  { %v563_v4 = vpop.eup %562 }
 0x65f   :  { %v276_v5 = vadd.f32 1.0, %v563_v4 }
 0x661   :  { %564 = vrcp.f32 %v276_v5 }
 0x66e   :  { %v565_v6 = vpop.eup %564 }
 0x66f   :  { %v280_v9 = vmul.f32 %v565_v6, %v222_v43 }
 0x6cf   :  { %v283_v7 = vpop.permute.xlu1 %282 }
 0x6d0   :  { %v285_v8 = vmul.f32 %v565_v6, %v283_v7 }
 0x6d2   :  { %287 = vrot.lane.b32.xlu0 %v285_v8, %s621_s22 }
 0x744   :  { %v288_v10 = vpop.permute.xlu0 %287 }
 0x745   :  { %v290_v11 = vadd.f32 %v288_v10, %v280_v9 }
 0x747   :  { %566 = vtanh.f32 %v290_v11 }
 0x754   :  { %v567_v12 = vpop.eup %566 }
 0x755   :  { %293 = vrot.lane.b32.xlu1 %v567_v12, %s621_s22 }
 0x7c7   :  { %v294_v13 = vpop.permute.xlu1 %293 }
 0x7c8   :  { %v748_v14 = vmul.f32 %v565_v6, %v294_v13 }
 0x7ca   :  { %311 = vperm.xlu1 %530, %v748_v14   ;;  %306 = vperm.xlu0 %529, %v748_v14  }
 0x7ce   :  { %531 = vset.pattern.permute.xlu1 %v625_v26  ;;  %532 = vset.pattern.permute.xlu0 %v626_v27 }
 0x7cf   :  { %316 = vperm.xlu1 %531, %v748_v14   ;;  %321 = vperm.xlu0 %532, %v748_v14  }
 0x7d3   :  { %533 = vset.pattern.permute.xlu1 %v624_v25  ;;  %535 = vset.pattern.permute.xlu0 %v627_v28 }
 0x7d4   :  { %326 = vperm.xlu1 %533, %v748_v14  }
 0x7d8   :  { %534 = vset.pattern.permute.xlu1 %v627_v28  ;;  %v304_v28 = vld [vmem:[%s303_s30] sm:$0x1] }
 0x7d9   :  { %331 = vperm.xlu1 %534, %v748_v14  }
 0x845   :  { %v312_v15 = vpop.permute.xlu1 %311  ;;  %v307_v16 = vpop.permute.xlu0 %306 }
 0x846   :  { %v314_v19 = vmul.f32 %v312_v15, %v678_v30  ;;  %v309_v25 = vmul.f32 %v307_v16, %v652_v0 }
 0x848   :  { %v335_v29 = vadd.f32 %v314_v19, %v309_v25 }
 0x84a   :  { %v317_v26 = vpop.permute.xlu1 %316  ;;  %v322_v17 = vpop.permute.xlu0 %321 }
 0x84b   :  { %v319_v27 = vmul.f32 %v317_v26, %v681_v33  ;;  %v324_v18 = vmul.f32 %v322_v17, %v684_v34 }
 0x84d   :  { %v336_v22 = vadd.f32 %v324_v18, %v319_v27 }
 0x84f   :  { %v327_v23 = vpop.permute.xlu1 %326  ;;  %v337_v31 = vadd.f32 %v336_v22, %v335_v29 }
 0x850   :  { %v329_v35 = vmul.f32 %v327_v23, %v691_v40 }
 0x851   :  { %v338_v37 = vadd.f32 %v337_v31, %v304_v28 }
 0x854   :  { %v332_v32 = vpop.permute.xlu1 %331 }
 0x855   :  { %v334_v36 = vmul.f32 %v332_v32, %v694_v41 }
 0x857   :  { %v339_v38 = vadd.f32 %v334_v36, %v329_v35 }
 0x859   :  { %v340_v33 = vadd.f32 %v339_v38, %v338_v37 }
 0x85b   :  { %568 = vtanh.f32 %v340_v33  ;;  %v485_v30 = vmul.f32 -1.442695, %v340_v33 }
 0x85d   :  { %570 = vpow2.f32 %v485_v30 }
 0x868   :  { %v569_v34 = vpop.eup %568 }
 0x869   :  { %350 = vrot.lane.b32.xlu0 %v569_v34, %s620_s1 }
 0x86a   :  { %v571_v0 = vpop.eup %570 }
 0x86b   :  { %v344_v39 = vadd.f32 1.0, %v571_v0 }
 0x86d   :  { %572 = vrcp.f32 %v344_v39 }
 0x87a   :  { %v573_v40 = vpop.eup %572 }
 0x87b   :  { %v348_v44 = vmul.f32 %v573_v40, %v290_v11 }
 0x8db   :  { %v351_v43 = vpop.permute.xlu0 %350 }
 0x8dc   :  { %v353_v41 = vmul.f32 %v573_v40, %v351_v43 }
 0x8de   :  { %355 = vrot.lane.b32.xlu1 %v353_v41, %s621_s22 }
 0x8e2   :  { %82 = vrot.lane.b32.xlu1 %v663_v24, %s629_s3  ;;  %v370_v24 = vld [vmem:[#allocation6 + $0x18] sm:$0x3f] }
 0x8e3   :  { %492 = vmatpush3.msk.msra.mxu0 %vm380_vm2, %v370_v24 }
 0x8e6   :  { %230 = vrot.lane.b32.xlu1 %v725_v46, %s629_s3 }
 0x950   :  { %v356_v45 = vpop.permute.xlu1 %355 }
 0x951   :  { %v358_v47 = vadd.f32 %v356_v45, %v348_v44 }
 0x953   :  { %574 = vtanh.f32 %v358_v47 }
 0x954   :  { %v83_v48 = vpop.permute.xlu1 %82 }
 0x955   :  { %86 = vst.msk [vmem:[#allocation2] sm:$0x1] %vm85_vm1, %v83_v48 }
 0x958   :  { %v231_v49 = vpop.permute.xlu1 %230 }
 0x959   :  { %233 = vst.msk [vmem:[#allocation2 + $0x2] sm:$0x1] %vm85_vm1, %v231_v49 }
 0x960   :  { %v575_v50 = vpop.eup %574 }
 0x961   :  { %361 = vrot.lane.b32.xlu0 %v575_v50, %s621_s22 }
 0x965   :  { %162 = vrot.lane.b32.xlu0 %v702_v2, %s629_s3 }
 0x969   :  { %298 = vrot.lane.b32.xlu0 %v748_v14, %s629_s3 }
 0x9d3   :  { %v362_v46 = vpop.permute.xlu0 %361 }
 0x9d4   :  { %v364_v51 = vmul.f32 %v573_v40, %v362_v46 }
 0x9d6   :  { %366 = vrot.lane.b32.xlu1 %v364_v51, %s629_s3 }
 0x9d7   :  { %v163_v52 = vpop.permute.xlu0 %162 }
 0x9d8   :  { %165 = vst.msk [vmem:[#allocation2 + $0x1] sm:$0x1] %vm85_vm1, %v163_v52 }
 0x9db   :  { %v299_v53 = vpop.permute.xlu0 %298 }
 0x9dc   :  { %301 = vst.msk [vmem:[#allocation2 + $0x3] sm:$0x1] %vm85_vm1, %v299_v53 }
 0xa48   :  { %v367_v21 = vpop.permute.xlu1 %366 }
 0xa49   :  { %369 = vst.msk [vmem:[#allocation2 + $0x4] sm:$0x1] %vm85_vm1, %v367_v21 }
 0xa50   :  { %v372_v2 = vld [vmem:[#allocation2] sm:$0xff] }
 0xa51   :  { %494 = vmatmul.mubr.msk.f32.vlgmr.msra.gmra.mxu0 %vm39_vm0, %v372_v2 }
 0xb11   :  { %v450_v55 = vpop.f32.mrf.mxu0 }
 0xb12   :  { %v451_v56 = vadd.f32 %v486_v54, %v450_v55 }
 0xb13   :  { %v495_v57 = vpop.f32.mrf.mxu0 }
 0xb14   :  { %454 = vmax.xlane.f32.xlu0 %v451_v56 }
 0xb9d   :  { %v455_v58 = vpop.xlane.xlu0 %454 }
 0xb9e   :  { %v456_v20 = vsub.f32 %v451_v56, %v455_v58 }
 0xba0   :  { %v457_v59 = vmul.f32 1.442695, %v456_v20 }
 0xba2   :  { %576 = vpow2.f32 %v457_v59 }
 0xbaf   :  { %v577_v60 = vpop.eup %576 }
 0xbb0   :  { %459 = vadd.xlane.f32.xlu1 %v577_v60 }
 0xc39   :  { %v460_v61 = vpop.xlane.xlu1 %459 }
 0xc3a   :  { %578 = vlog2.f32 %v460_v61 }
 0xc47   :  { %v579_v62 = vpop.eup %578 }
 0xc48   :  { %v462_v63 = vmul.f32 0.6931472, %v579_v62 }
 0xc4a   :  { %v463_v1 = vadd.f32 %v462_v63, %v455_v58 }
 0xc4c   :  { %v464_v3 = vsub.f32 %v451_v56, %v463_v1 }
 0xc4e   :  { %465 = vst [vmem:[%s786_s2] sm:$0xff] %v464_v3 }
 0xc4f   :  { %470 = vsyncpa [#allocation4], 1 }
 0xc50   :  { %471 = vsyncpa [#allocation5], 1 }

</bundles_post_ra>
